<compile_context>
chip_gen: v7x
topology: tpu7x:2x2x1
jax: 0.10.0
libtpu: 0.0.40
codegen_flags: <defaults>
</compile_context>

<pallas_src>
import functools

import jax
import jax.numpy as jnp
from jax import lax
from jax.experimental import pallas as pl
from jax.experimental.pallas import tpu as pltpu


def vseq_kernel(len_ref, sta_ref, tempf_ref,
                wemb_ref, bemb_ref, wte_ref, bte_ref,
                wih_ref, whh_ref, blstm_ref,
                out_ref, *, B, T, hidden_temp):
    """Static embed + batched temporal embed + masked LSTM recurrence, one store."""
    H = hidden_temp

    # --- static branch: tanh(sta @ W_emb + b_emb) -----------------------------------
    repr_sta = jnp.tanh(
        jnp.dot(sta_ref[...], wemb_ref[...], preferred_element_type=jnp.float32)
        + bemb_ref[...])

    # --- input-only temporal path, batched over all T steps (off the serial path) ---
    x_all = jnp.tanh(
        jnp.dot(tempf_ref[...], wte_ref[...], preferred_element_type=jnp.float32)
        + bte_ref[...])                                          # (T*B, E)
    gates_in = (jnp.dot(x_all, wih_ref[...], preferred_element_type=jnp.float32)
                + blstm_ref[...])                                # (T*B, 4H), [f|i|o|g]

    # --- hoisted loop invariants ------------------------------------------------------
    whh = whh_ref[...]                                           # (H, 4H) bf16
    len_b = jnp.broadcast_to(len_ref[...], (B, H))               # (B, H) int32, hoisted
    lane = lax.broadcasted_iota(jnp.int32, (B, 4 * H), 1)
    is_g = lane >= 3 * H                                         # tanh quadrant (g gate)
    scale = jnp.where(is_g, 1.0, 0.5)        # sigmoid(x) = 0.5*tanh(x/2) + 0.5
    offset = jnp.where(is_g, 0.0, 0.5)

    h = jnp.zeros((B, H), jnp.float32)
    c = jnp.zeros((B, H), jnp.float32)

    # --- fully-unrolled recurrence: h/c carried as values (no scratch, no pl.when) ----
    # T is small & fixed; a static Python loop keeps every slice index static.
    for t in range(T):
        gates = (gates_in[t * B:(t + 1) * B, :]
                 + jnp.dot(h.astype(jnp.bfloat16), whh,
                           preferred_element_type=jnp.float32))  # (B, 4H) f32
        # One EUP pass + one FMA activates all four gates: [F | I | O | G]
        act = jnp.tanh(gates * scale) * scale + offset
        rolled = pltpu.roll(act, shift=2 * H, axis=1)            # [O | G | F | I]
        prod = act * rolled                                      # i*g in quadrants 1 & 3
        ig = pltpu.roll(prod, shift=H, axis=1)[:, :H]            # i*g at lanes [0, H)
        c_new = act[:, :H] * c + ig                              # f*c + i*g
        h_new = rolled[:, :H] * jnp.tanh(c_new)                  # o*tanh(c_new)
        # pack_padded_sequence semantics: state frozen once t >= lengths[b]
        valid = t < len_b
        h = jnp.where(valid, h_new, h)
        c = jnp.where(valid, c_new, c)

    # --- single fused output store: [ repr_sta | h_final ] ----------------------------
    out_ref[...] = jnp.concatenate([repr_sta, h], axis=1)


def _permute_lstm_gate_cols(w):
    """Reorder gate columns from PyTorch order [i|f|g|o] to kernel order [f|i|o|g]."""
    H = w.shape[-1] // 4
    i, f, g, o = (w[..., 0:H], w[..., H:2 * H], w[..., 2 * H:3 * H], w[..., 3 * H:])
    return jnp.concatenate([f, i, o, g], axis=-1)


@jax.jit
def vsequence_feature(sta, temp, lengths, params):
    """Glue (transpose/flatten/gate-permute/bf16 cast) + pallas_call, in one jit."""
    B, _ = sta.shape
    _, T, F_temp = temp.shape
    Hs = params["w_emb"].shape[1]
    H = params["w_hh"].shape[0]

    # Time-major flatten: row index = t*B + b -> each step reads one contiguous slab.
    temp_flat = jnp.transpose(temp, (1, 0, 2)).reshape(T * B, F_temp)
    len2d = lengths.reshape(B, 1).astype(jnp.int32)

    # Host/XLA-side (free) gate-column permutation + bf16 cast of the recurrent weight.
    w_ih = _permute_lstm_gate_cols(params["w_ih"])
    w_hh = _permute_lstm_gate_cols(params["w_hh"]).astype(jnp.bfloat16)
    b_lstm = _permute_lstm_gate_cols(params["b_lstm"])

    vmem = pl.BlockSpec(memory_space=pltpu.MemorySpace.VMEM)
    kernel = functools.partial(vseq_kernel, B=B, T=T, hidden_temp=H)

    # TODO(synk): if B grows, add a batch grid axis (multiples of 8 rows) with
    # dimension_semantics=("parallel",) so v7x's second TensorCore splits the batch;
    # at B=8 everything is a few KB and whole-array VMEM residency is optimal on
    # v5e / v6e / v7x, so a single invocation with no grid is the right shape here.
    return pl.pallas_call(
        kernel,
        out_shape=jax.ShapeDtypeStruct((B, Hs + H), jnp.float32),
        in_specs=[vmem] * 10,
        out_specs=vmem,
    )(len2d, sta, temp_flat,
      params["w_emb"], params["b_emb"],
      params["w_temp"], params["b_temp"],
      w_ih, w_hh, b_lstm)


def ref_forward(sta, temp, lengths, p):
    """Pure-JAX reference mirroring the PyTorch forward semantics (gate order i,f,g,o)."""
    repr_sta = jnp.tanh(sta @ p["w_emb"] + p["b_emb"])
    x = jnp.tanh(temp @ p["w_temp"] + p["b_temp"])      # (B, T, E)
    B, T, _ = x.shape
    H = p["w_hh"].shape[0]
    h = jnp.zeros((B, H), jnp.float32)
    c = jnp.zeros((B, H), jnp.float32)
    for t in range(T):
        gates = x[:, t] @ p["w_ih"] + h @ p["w_hh"] + p["b_lstm"]
        i = jax.nn.sigmoid(gates[:, :H])
        f = jax.nn.sigmoid(gates[:, H:2 * H])
        g = jnp.tanh(gates[:, 2 * H:3 * H])
        o = jax.nn.sigmoid(gates[:, 3 * H:])
        c_new = f * c + i * g
        h_new = o * jnp.tanh(c_new)
        valid = (t < lengths).reshape(B, 1)
        h = jnp.where(valid, h_new, h)
        c = jnp.where(valid, c_new, c)
    return jnp.concatenate([repr_sta, h], axis=1)


if __name__ == "__main__":
    # module config (small): n_feature_sta=16, n_feature_temp=8,
    # n_hidden_sta=32, n_hidden_temp=32, model='lstm', n_embedding_temp=16
    B, T = 8, 8
    F_STA, F_TEMP = 16, 8
    H_STA, H_TEMP, E_TEMP = 32, 32, 16

    key = jax.random.PRNGKey(0)
    ks = jax.random.split(key, 10)

    # deterministic synthetic parameters (weights stored pre-transposed: x @ W + b),
    # stored in PyTorch gate order [i|f|g|o]; the wrapper permutes them for the kernel.
    params = {
        "w_emb":  0.1 * jax.random.normal(ks[0], (F_STA, H_STA), jnp.float32),
        "b_emb":  0.1 * jax.random.normal(ks[1], (1, H_STA), jnp.float32),
        "w_temp": 0.1 * jax.random.normal(ks[2], (F_TEMP, E_TEMP), jnp.float32),
        "b_temp": 0.1 * jax.random.normal(ks[3], (1, E_TEMP), jnp.float32),
        "w_ih":   0.1 * jax.random.normal(ks[4], (E_TEMP, 4 * H_TEMP), jnp.float32),
        "w_hh":   0.1 * jax.random.normal(ks[5], (H_TEMP, 4 * H_TEMP), jnp.float32),
        # combined b_ih + b_hh
        "b_lstm": 0.1 * jax.random.normal(ks[6], (1, 4 * H_TEMP), jnp.float32),
    }

    sta = jax.random.normal(ks[7], (B, F_STA), jnp.float32)
    temp = jax.random.normal(ks[8], (B, T, F_TEMP), jnp.float32)
    lengths = jnp.array([8, 5, 3, 1, 7, 2, 8, 4], dtype=jnp.int32)

    out = jax.block_until_ready(vsequence_feature(sta, temp, lengths, params))
    ref = ref_forward(sta, temp, lengths, params)

    assert out.shape == (B, H_STA + H_TEMP)
    # bf16 MXU operands on the recurrent h @ W_hh (f32 accumulate) introduce ~1e-3
    # level deviations vs. the all-f32 reference; everything else is exact-path f32.
    assert jnp.allclose(out, ref, atol=5e-3, rtol=5e-3), "mismatch vs reference"

    print("KERNEL_OK")
</pallas_src>

<mosaic_0001>
module attributes {stable_mosaic.version = 11 : i64} {
  func.func @vseq_kernel(%arg0: memref<8x1xi32, #tpu.memory_space<vmem>>, %arg1: memref<8x16xf32, #tpu.memory_space<vmem>>, %arg2: memref<64x8xf32, #tpu.memory_space<vmem>>, %arg3: memref<16x32xf32, #tpu.memory_space<vmem>>, %arg4: memref<1x32xf32, #tpu.memory_space<vmem>>, %arg5: memref<8x16xf32, #tpu.memory_space<vmem>>, %arg6: memref<1x16xf32, #tpu.memory_space<vmem>>, %arg7: memref<16x128xf32, #tpu.memory_space<vmem>>, %arg8: memref<32x128xbf16, #tpu.memory_space<vmem>>, %arg9: memref<1x128xf32, #tpu.memory_space<vmem>>, %arg10: memref<8x64xf32, #tpu.memory_space<vmem>>) attributes {dimension_semantics = [], scalar_prefetch = 0 : i64, scratch_operands = 0 : i64, tpu.core_type = #tpu.core_type<tc>} {
    %c0 = arith.constant 0 : index
    %c0_0 = arith.constant 0 : index
    %0 = vector.load %arg1[%c0, %c0_0] : memref<8x16xf32, #tpu.memory_space<vmem>>, vector<8x16xf32>
    %c0_1 = arith.constant 0 : index
    %c0_2 = arith.constant 0 : index
    %1 = vector.load %arg3[%c0_1, %c0_2] : memref<16x32xf32, #tpu.memory_space<vmem>>, vector<16x32xf32>
    %cst = arith.constant dense<0.000000e+00> : vector<8x32xf32>
    %2 = tpu.matmul %0, %1, %cst {dimension_numbers = #tpu.dot_dimension_numbers<[1], [0], [0], [1], [0, 0, 1, 1], [], []>} : vector<8x16xf32>, vector<16x32xf32>, vector<8x32xf32> -> vector<8x32xf32>
    %c0_3 = arith.constant 0 : index
    %c0_4 = arith.constant 0 : index
    %3 = vector.load %arg4[%c0_3, %c0_4] : memref<1x32xf32, #tpu.memory_space<vmem>>, vector<1x32xf32>
    %4 = vector.broadcast %3 : vector<1x32xf32> to vector<8x32xf32>
    %5 = arith.addf %2, %4 : vector<8x32xf32>
    %6 = math.tanh %5 : vector<8x32xf32>
    %c0_5 = arith.constant 0 : index
    %c0_6 = arith.constant 0 : index
    %7 = vector.load %arg2[%c0_5, %c0_6] : memref<64x8xf32, #tpu.memory_space<vmem>>, vector<64x8xf32>
    %c0_7 = arith.constant 0 : index
    %c0_8 = arith.constant 0 : index
    %8 = vector.load %arg5[%c0_7, %c0_8] : memref<8x16xf32, #tpu.memory_space<vmem>>, vector<8x16xf32>
    %cst_9 = arith.constant dense<0.000000e+00> : vector<64x16xf32>
    %9 = tpu.matmul %7, %8, %cst_9 {dimension_numbers = #tpu.dot_dimension_numbers<[1], [0], [0], [1], [0, 0, 1, 1], [], []>} : vector<64x8xf32>, vector<8x16xf32>, vector<64x16xf32> -> vector<64x16xf32>
    %c0_10 = arith.constant 0 : index
    %c0_11 = arith.constant 0 : index
    %10 = vector.load %arg6[%c0_10, %c0_11] : memref<1x16xf32, #tpu.memory_space<vmem>>, vector<1x16xf32>
    %11 = vector.broadcast %10 : vector<1x16xf32> to vector<64x16xf32>
    %12 = arith.addf %9, %11 : vector<64x16xf32>
    %13 = math.tanh %12 : vector<64x16xf32>
    %c0_12 = arith.constant 0 : index
    %c0_13 = arith.constant 0 : index
    %14 = vector.load %arg7[%c0_12, %c0_13] : memref<16x128xf32, #tpu.memory_space<vmem>>, vector<16x128xf32>
    %cst_14 = arith.constant dense<0.000000e+00> : vector<64x128xf32>
    %15 = tpu.matmul %13, %14, %cst_14 {dimension_numbers = #tpu.dot_dimension_numbers<[1], [0], [0], [1], [0, 0, 1, 1], [], []>} : vector<64x16xf32>, vector<16x128xf32>, vector<64x128xf32> -> vector<64x128xf32>
    %c0_15 = arith.constant 0 : index
    %c0_16 = arith.constant 0 : index
    %16 = vector.load %arg9[%c0_15, %c0_16] : memref<1x128xf32, #tpu.memory_space<vmem>>, vector<1x128xf32>
    %17 = vector.broadcast %16 : vector<1x128xf32> to vector<64x128xf32>
    %18 = arith.addf %15, %17 : vector<64x128xf32>
    %c0_17 = arith.constant 0 : index
    %c0_18 = arith.constant 0 : index
    %19 = vector.load %arg8[%c0_17, %c0_18] : memref<32x128xbf16, #tpu.memory_space<vmem>>, vector<32x128xbf16>
    %c0_19 = arith.constant 0 : index
    %c0_20 = arith.constant 0 : index
    %20 = vector.load %arg0[%c0_19, %c0_20] : memref<8x1xi32, #tpu.memory_space<vmem>>, vector<8x1xi32>
    %21 = vector.shape_cast %20 : vector<8x1xi32> to vector<8x1xi32>
    %22 = vector.broadcast %21 : vector<8x1xi32> to vector<8x32xi32>
    %23 = tpu.iota {dimensions = array<i32: 1>} : vector<8x128xi32>
    %c96_i32 = arith.constant 96 : i32
    %24 = vector.broadcast %c96_i32 : i32 to vector<8x128xi32>
    %25 = arith.cmpi sge, %23, %24 : vector<8x128xi32>
    %cst_21 = arith.constant 1.000000e+00 : f32
    %cst_22 = arith.constant 5.000000e-01 : f32
    %26 = vector.broadcast %cst_21 : f32 to vector<8x128xf32>
    %27 = vector.broadcast %cst_22 : f32 to vector<8x128xf32>
    %28 = arith.select %25, %26, %27 : vector<8x128xi1>, vector<8x128xf32>
    %cst_23 = arith.constant 0.000000e+00 : f32
    %cst_24 = arith.constant 5.000000e-01 : f32
    %29 = vector.broadcast %cst_23 : f32 to vector<8x128xf32>
    %30 = vector.broadcast %cst_24 : f32 to vector<8x128xf32>
    %31 = arith.select %25, %29, %30 : vector<8x128xi1>, vector<8x128xf32>
    %cst_25 = arith.constant 0.000000e+00 : f32
    %32 = vector.broadcast %cst_25 : f32 to vector<8x32xf32>
    %cst_26 = arith.constant 0.000000e+00 : f32
    %33 = vector.broadcast %cst_26 : f32 to vector<8x32xf32>
    %34 = vector.extract_strided_slice %18 {offsets = [0, 0], sizes = [8, 128], strides = [1, 1]} : vector<64x128xf32> to vector<8x128xf32>
    %35 = arith.truncf %32 : vector<8x32xf32> to vector<8x32xbf16>
    %cst_27 = arith.constant dense<0.000000e+00> : vector<8x128xf32>
    %36 = tpu.matmul %35, %19, %cst_27 {dimension_numbers = #tpu.dot_dimension_numbers<[1], [0], [0], [1], [0, 0, 1, 1], [], []>} : vector<8x32xbf16>, vector<32x128xbf16>, vector<8x128xf32> -> vector<8x128xf32>
    %37 = arith.addf %34, %36 : vector<8x128xf32>
    %38 = arith.mulf %37, %28 : vector<8x128xf32>
    %39 = math.tanh %38 : vector<8x128xf32>
    %40 = arith.mulf %39, %28 : vector<8x128xf32>
    %41 = arith.addf %40, %31 : vector<8x128xf32>
    %c64_i32 = arith.constant 64 : i32
    %42 = tpu.dynamic_rotate %41 by %c64_i32 dim 1 : vector<8x128xf32>, i32 -> vector<8x128xf32>
    %43 = arith.mulf %41, %42 : vector<8x128xf32>
    %c32_i32 = arith.constant 32 : i32
    %44 = tpu.dynamic_rotate %43 by %c32_i32 dim 1 : vector<8x128xf32>, i32 -> vector<8x128xf32>
    %45 = vector.extract_strided_slice %44 {offsets = [0, 0], sizes = [8, 32], strides = [1, 1]} : vector<8x128xf32> to vector<8x32xf32>
    %46 = vector.extract_strided_slice %41 {offsets = [0, 0], sizes = [8, 32], strides = [1, 1]} : vector<8x128xf32> to vector<8x32xf32>
    %47 = arith.mulf %46, %33 : vector<8x32xf32>
    %48 = arith.addf %47, %45 : vector<8x32xf32>
    %49 = vector.extract_strided_slice %42 {offsets = [0, 0], sizes = [8, 32], strides = [1, 1]} : vector<8x128xf32> to vector<8x32xf32>
    %50 = math.tanh %48 : vector<8x32xf32>
    %51 = arith.mulf %49, %50 : vector<8x32xf32>
    %c0_i32 = arith.constant 0 : i32
    %52 = vector.broadcast %c0_i32 : i32 to vector<8x32xi32>
    %53 = arith.cmpi sgt, %22, %52 : vector<8x32xi32>
    %54 = arith.select %53, %51, %32 : vector<8x32xi1>, vector<8x32xf32>
    %55 = arith.select %53, %48, %33 : vector<8x32xi1>, vector<8x32xf32>
    %56 = vector.extract_strided_slice %18 {offsets = [8, 0], sizes = [8, 128], strides = [1, 1]} : vector<64x128xf32> to vector<8x128xf32>
    %57 = arith.truncf %54 : vector<8x32xf32> to vector<8x32xbf16>
    %cst_28 = arith.constant dense<0.000000e+00> : vector<8x128xf32>
    %58 = tpu.matmul %57, %19, %cst_28 {dimension_numbers = #tpu.dot_dimension_numbers<[1], [0], [0], [1], [0, 0, 1, 1], [], []>} : vector<8x32xbf16>, vector<32x128xbf16>, vector<8x128xf32> -> vector<8x128xf32>
    %59 = arith.addf %56, %58 : vector<8x128xf32>
    %60 = arith.mulf %59, %28 : vector<8x128xf32>
    %61 = math.tanh %60 : vector<8x128xf32>
    %62 = arith.mulf %61, %28 : vector<8x128xf32>
    %63 = arith.addf %62, %31 : vector<8x128xf32>
    %c64_i32_29 = arith.constant 64 : i32
    %64 = tpu.dynamic_rotate %63 by %c64_i32_29 dim 1 : vector<8x128xf32>, i32 -> vector<8x128xf32>
    %65 = arith.mulf %63, %64 : vector<8x128xf32>
    %c32_i32_30 = arith.constant 32 : i32
    %66 = tpu.dynamic_rotate %65 by %c32_i32_30 dim 1 : vector<8x128xf32>, i32 -> vector<8x128xf32>
    %67 = vector.extract_strided_slice %66 {offsets = [0, 0], sizes = [8, 32], strides = [1, 1]} : vector<8x128xf32> to vector<8x32xf32>
    %68 = vector.extract_strided_slice %63 {offsets = [0, 0], sizes = [8, 32], strides = [1, 1]} : vector<8x128xf32> to vector<8x32xf32>
    %69 = arith.mulf %68, %55 : vector<8x32xf32>
    %70 = arith.addf %69, %67 : vector<8x32xf32>
    %71 = vector.extract_strided_slice %64 {offsets = [0, 0], sizes = [8, 32], strides = [1, 1]} : vector<8x128xf32> to vector<8x32xf32>
    %72 = math.tanh %70 : vector<8x32xf32>
    %73 = arith.mulf %71, %72 : vector<8x32xf32>
    %c1_i32 = arith.constant 1 : i32
    %74 = vector.broadcast %c1_i32 : i32 to vector<8x32xi32>
    %75 = arith.cmpi sgt, %22, %74 : vector<8x32xi32>
    %76 = arith.select %75, %73, %54 : vector<8x32xi1>, vector<8x32xf32>
    %77 = arith.select %75, %70, %55 : vector<8x32xi1>, vector<8x32xf32>
    %78 = vector.extract_strided_slice %18 {offsets = [16, 0], sizes = [8, 128], strides = [1, 1]} : vector<64x128xf32> to vector<8x128xf32>
    %79 = arith.truncf %76 : vector<8x32xf32> to vector<8x32xbf16>
    %cst_31 = arith.constant dense<0.000000e+00> : vector<8x128xf32>
    %80 = tpu.matmul %79, %19, %cst_31 {dimension_numbers = #tpu.dot_dimension_numbers<[1], [0], [0], [1], [0, 0, 1, 1], [], []>} : vector<8x32xbf16>, vector<32x128xbf16>, vector<8x128xf32> -> vector<8x128xf32>
    %81 = arith.addf %78, %80 : vector<8x128xf32>
    %82 = arith.mulf %81, %28 : vector<8x128xf32>
    %83 = math.tanh %82 : vector<8x128xf32>
    %84 = arith.mulf %83, %28 : vector<8x128xf32>
    %85 = arith.addf %84, %31 : vector<8x128xf32>
    %c64_i32_32 = arith.constant 64 : i32
    %86 = tpu.dynamic_rotate %85 by %c64_i32_32 dim 1 : vector<8x128xf32>, i32 -> vector<8x128xf32>
    %87 = arith.mulf %85, %86 : vector<8x128xf32>
    %c32_i32_33 = arith.constant 32 : i32
    %88 = tpu.dynamic_rotate %87 by %c32_i32_33 dim 1 : vector<8x128xf32>, i32 -> vector<8x128xf32>
    %89 = vector.extract_strided_slice %88 {offsets = [0, 0], sizes = [8, 32], strides = [1, 1]} : vector<8x128xf32> to vector<8x32xf32>
    %90 = vector.extract_strided_slice %85 {offsets = [0, 0], sizes = [8, 32], strides = [1, 1]} : vector<8x128xf32> to vector<8x32xf32>
    %91 = arith.mulf %90, %77 : vector<8x32xf32>
    %92 = arith.addf %91, %89 : vector<8x32xf32>
    %93 = vector.extract_strided_slice %86 {offsets = [0, 0], sizes = [8, 32], strides = [1, 1]} : vector<8x128xf32> to vector<8x32xf32>
    %94 = math.tanh %92 : vector<8x32xf32>
    %95 = arith.mulf %93, %94 : vector<8x32xf32>
    %c2_i32 = arith.constant 2 : i32
    %96 = vector.broadcast %c2_i32 : i32 to vector<8x32xi32>
    %97 = arith.cmpi sgt, %22, %96 : vector<8x32xi32>
    %98 = arith.select %97, %95, %76 : vector<8x32xi1>, vector<8x32xf32>
    %99 = arith.select %97, %92, %77 : vector<8x32xi1>, vector<8x32xf32>
    %100 = vector.extract_strided_slice %18 {offsets = [24, 0], sizes = [8, 128], strides = [1, 1]} : vector<64x128xf32> to vector<8x128xf32>
    %101 = arith.truncf %98 : vector<8x32xf32> to vector<8x32xbf16>
    %cst_34 = arith.constant dense<0.000000e+00> : vector<8x128xf32>
    %102 = tpu.matmul %101, %19, %cst_34 {dimension_numbers = #tpu.dot_dimension_numbers<[1], [0], [0], [1], [0, 0, 1, 1], [], []>} : vector<8x32xbf16>, vector<32x128xbf16>, vector<8x128xf32> -> vector<8x128xf32>
    %103 = arith.addf %100, %102 : vector<8x128xf32>
    %104 = arith.mulf %103, %28 : vector<8x128xf32>
    %105 = math.tanh %104 : vector<8x128xf32>
    %106 = arith.mulf %105, %28 : vector<8x128xf32>
    %107 = arith.addf %106, %31 : vector<8x128xf32>
    %c64_i32_35 = arith.constant 64 : i32
    %108 = tpu.dynamic_rotate %107 by %c64_i32_35 dim 1 : vector<8x128xf32>, i32 -> vector<8x128xf32>
    %109 = arith.mulf %107, %108 : vector<8x128xf32>
    %c32_i32_36 = arith.constant 32 : i32
    %110 = tpu.dynamic_rotate %109 by %c32_i32_36 dim 1 : vector<8x128xf32>, i32 -> vector<8x128xf32>
    %111 = vector.extract_strided_slice %110 {offsets = [0, 0], sizes = [8, 32], strides = [1, 1]} : vector<8x128xf32> to vector<8x32xf32>
    %112 = vector.extract_strided_slice %107 {offsets = [0, 0], sizes = [8, 32], strides = [1, 1]} : vector<8x128xf32> to vector<8x32xf32>
    %113 = arith.mulf %112, %99 : vector<8x32xf32>
    %114 = arith.addf %113, %111 : vector<8x32xf32>
    %115 = vector.extract_strided_slice %108 {offsets = [0, 0], sizes = [8, 32], strides = [1, 1]} : vector<8x128xf32> to vector<8x32xf32>
    %116 = math.tanh %114 : vector<8x32xf32>
    %117 = arith.mulf %115, %116 : vector<8x32xf32>
    %c3_i32 = arith.constant 3 : i32
    %118 = vector.broadcast %c3_i32 : i32 to vector<8x32xi32>
    %119 = arith.cmpi sgt, %22, %118 : vector<8x32xi32>
    %120 = arith.select %119, %117, %98 : vector<8x32xi1>, vector<8x32xf32>
    %121 = arith.select %119, %114, %99 : vector<8x32xi1>, vector<8x32xf32>
    %122 = vector.extract_strided_slice %18 {offsets = [32, 0], sizes = [8, 128], strides = [1, 1]} : vector<64x128xf32> to vector<8x128xf32>
    %123 = arith.truncf %120 : vector<8x32xf32> to vector<8x32xbf16>
    %cst_37 = arith.constant dense<0.000000e+00> : vector<8x128xf32>
    %124 = tpu.matmul %123, %19, %cst_37 {dimension_numbers = #tpu.dot_dimension_numbers<[1], [0], [0], [1], [0, 0, 1, 1], [], []>} : vector<8x32xbf16>, vector<32x128xbf16>, vector<8x128xf32> -> vector<8x128xf32>
    %125 = arith.addf %122, %124 : vector<8x128xf32>
    %126 = arith.mulf %125, %28 : vector<8x128xf32>
    %127 = math.tanh %126 : vector<8x128xf32>
    %128 = arith.mulf %127, %28 : vector<8x128xf32>
    %129 = arith.addf %128, %31 : vector<8x128xf32>
    %c64_i32_38 = arith.constant 64 : i32
    %130 = tpu.dynamic_rotate %129 by %c64_i32_38 dim 1 : vector<8x128xf32>, i32 -> vector<8x128xf32>
    %131 = arith.mulf %129, %130 : vector<8x128xf32>
    %c32_i32_39 = arith.constant 32 : i32
    %132 = tpu.dynamic_rotate %131 by %c32_i32_39 dim 1 : vector<8x128xf32>, i32 -> vector<8x128xf32>
    %133 = vector.extract_strided_slice %132 {offsets = [0, 0], sizes = [8, 32], strides = [1, 1]} : vector<8x128xf32> to vector<8x32xf32>
    %134 = vector.extract_strided_slice %129 {offsets = [0, 0], sizes = [8, 32], strides = [1, 1]} : vector<8x128xf32> to vector<8x32xf32>
    %135 = arith.mulf %134, %121 : vector<8x32xf32>
    %136 = arith.addf %135, %133 : vector<8x32xf32>
    %137 = vector.extract_strided_slice %130 {offsets = [0, 0], sizes = [8, 32], strides = [1, 1]} : vector<8x128xf32> to vector<8x32xf32>
    %138 = math.tanh %136 : vector<8x32xf32>
    %139 = arith.mulf %137, %138 : vector<8x32xf32>
    %c4_i32 = arith.constant 4 : i32
    %140 = vector.broadcast %c4_i32 : i32 to vector<8x32xi32>
    %141 = arith.cmpi sgt, %22, %140 : vector<8x32xi32>
    %142 = arith.select %141, %139, %120 : vector<8x32xi1>, vector<8x32xf32>
    %143 = arith.select %141, %136, %121 : vector<8x32xi1>, vector<8x32xf32>
    %144 = vector.extract_strided_slice %18 {offsets = [40, 0], sizes = [8, 128], strides = [1, 1]} : vector<64x128xf32> to vector<8x128xf32>
    %145 = arith.truncf %142 : vector<8x32xf32> to vector<8x32xbf16>
    %cst_40 = arith.constant dense<0.000000e+00> : vector<8x128xf32>
    %146 = tpu.matmul %145, %19, %cst_40 {dimension_numbers = #tpu.dot_dimension_numbers<[1], [0], [0], [1], [0, 0, 1, 1], [], []>} : vector<8x32xbf16>, vector<32x128xbf16>, vector<8x128xf32> -> vector<8x128xf32>
    %147 = arith.addf %144, %146 : vector<8x128xf32>
    %148 = arith.mulf %147, %28 : vector<8x128xf32>
    %149 = math.tanh %148 : vector<8x128xf32>
    %150 = arith.mulf %149, %28 : vector<8x128xf32>
    %151 = arith.addf %150, %31 : vector<8x128xf32>
    %c64_i32_41 = arith.constant 64 : i32
    %152 = tpu.dynamic_rotate %151 by %c64_i32_41 dim 1 : vector<8x128xf32>, i32 -> vector<8x128xf32>
    %153 = arith.mulf %151, %152 : vector<8x128xf32>
    %c32_i32_42 = arith.constant 32 : i32
    %154 = tpu.dynamic_rotate %153 by %c32_i32_42 dim 1 : vector<8x128xf32>, i32 -> vector<8x128xf32>
    %155 = vector.extract_strided_slice %154 {offsets = [0, 0], sizes = [8, 32], strides = [1, 1]} : vector<8x128xf32> to vector<8x32xf32>
    %156 = vector.extract_strided_slice %151 {offsets = [0, 0], sizes = [8, 32], strides = [1, 1]} : vector<8x128xf32> to vector<8x32xf32>
    %157 = arith.mulf %156, %143 : vector<8x32xf32>
    %158 = arith.addf %157, %155 : vector<8x32xf32>
    %159 = vector.extract_strided_slice %152 {offsets = [0, 0], sizes = [8, 32], strides = [1, 1]} : vector<8x128xf32> to vector<8x32xf32>
    %160 = math.tanh %158 : vector<8x32xf32>
    %161 = arith.mulf %159, %160 : vector<8x32xf32>
    %c5_i32 = arith.constant 5 : i32
    %162 = vector.broadcast %c5_i32 : i32 to vector<8x32xi32>
    %163 = arith.cmpi sgt, %22, %162 : vector<8x32xi32>
    %164 = arith.select %163, %161, %142 : vector<8x32xi1>, vector<8x32xf32>
    %165 = arith.select %163, %158, %143 : vector<8x32xi1>, vector<8x32xf32>
    %166 = vector.extract_strided_slice %18 {offsets = [48, 0], sizes = [8, 128], strides = [1, 1]} : vector<64x128xf32> to vector<8x128xf32>
    %167 = arith.truncf %164 : vector<8x32xf32> to vector<8x32xbf16>
    %cst_43 = arith.constant dense<0.000000e+00> : vector<8x128xf32>
    %168 = tpu.matmul %167, %19, %cst_43 {dimension_numbers = #tpu.dot_dimension_numbers<[1], [0], [0], [1], [0, 0, 1, 1], [], []>} : vector<8x32xbf16>, vector<32x128xbf16>, vector<8x128xf32> -> vector<8x128xf32>
    %169 = arith.addf %166, %168 : vector<8x128xf32>
    %170 = arith.mulf %169, %28 : vector<8x128xf32>
    %171 = math.tanh %170 : vector<8x128xf32>
    %172 = arith.mulf %171, %28 : vector<8x128xf32>
    %173 = arith.addf %172, %31 : vector<8x128xf32>
    %c64_i32_44 = arith.constant 64 : i32
    %174 = tpu.dynamic_rotate %173 by %c64_i32_44 dim 1 : vector<8x128xf32>, i32 -> vector<8x128xf32>
    %175 = arith.mulf %173, %174 : vector<8x128xf32>
    %c32_i32_45 = arith.constant 32 : i32
    %176 = tpu.dynamic_rotate %175 by %c32_i32_45 dim 1 : vector<8x128xf32>, i32 -> vector<8x128xf32>
    %177 = vector.extract_strided_slice %176 {offsets = [0, 0], sizes = [8, 32], strides = [1, 1]} : vector<8x128xf32> to vector<8x32xf32>
    %178 = vector.extract_strided_slice %173 {offsets = [0, 0], sizes = [8, 32], strides = [1, 1]} : vector<8x128xf32> to vector<8x32xf32>
    %179 = arith.mulf %178, %165 : vector<8x32xf32>
    %180 = arith.addf %179, %177 : vector<8x32xf32>
    %181 = vector.extract_strided_slice %174 {offsets = [0, 0], sizes = [8, 32], strides = [1, 1]} : vector<8x128xf32> to vector<8x32xf32>
    %182 = math.tanh %180 : vector<8x32xf32>
    %183 = arith.mulf %181, %182 : vector<8x32xf32>
    %c6_i32 = arith.constant 6 : i32
    %184 = vector.broadcast %c6_i32 : i32 to vector<8x32xi32>
    %185 = arith.cmpi sgt, %22, %184 : vector<8x32xi32>
    %186 = arith.select %185, %183, %164 : vector<8x32xi1>, vector<8x32xf32>
    %187 = arith.select %185, %180, %165 : vector<8x32xi1>, vector<8x32xf32>
    %188 = vector.extract_strided_slice %18 {offsets = [56, 0], sizes = [8, 128], strides = [1, 1]} : vector<64x128xf32> to vector<8x128xf32>
    %189 = arith.truncf %186 : vector<8x32xf32> to vector<8x32xbf16>
    %cst_46 = arith.constant dense<0.000000e+00> : vector<8x128xf32>
    %190 = tpu.matmul %189, %19, %cst_46 {dimension_numbers = #tpu.dot_dimension_numbers<[1], [0], [0], [1], [0, 0, 1, 1], [], []>} : vector<8x32xbf16>, vector<32x128xbf16>, vector<8x128xf32> -> vector<8x128xf32>
    %191 = arith.addf %188, %190 : vector<8x128xf32>
    %192 = arith.mulf %191, %28 : vector<8x128xf32>
    %193 = math.tanh %192 : vector<8x128xf32>
    %194 = arith.mulf %193, %28 : vector<8x128xf32>
    %195 = arith.addf %194, %31 : vector<8x128xf32>
    %c64_i32_47 = arith.constant 64 : i32
    %196 = tpu.dynamic_rotate %195 by %c64_i32_47 dim 1 : vector<8x128xf32>, i32 -> vector<8x128xf32>
    %197 = arith.mulf %195, %196 : vector<8x128xf32>
    %c32_i32_48 = arith.constant 32 : i32
    %198 = tpu.dynamic_rotate %197 by %c32_i32_48 dim 1 : vector<8x128xf32>, i32 -> vector<8x128xf32>
    %199 = vector.extract_strided_slice %198 {offsets = [0, 0], sizes = [8, 32], strides = [1, 1]} : vector<8x128xf32> to vector<8x32xf32>
    %200 = vector.extract_strided_slice %195 {offsets = [0, 0], sizes = [8, 32], strides = [1, 1]} : vector<8x128xf32> to vector<8x32xf32>
    %201 = arith.mulf %200, %187 : vector<8x32xf32>
    %202 = arith.addf %201, %199 : vector<8x32xf32>
    %203 = vector.extract_strided_slice %196 {offsets = [0, 0], sizes = [8, 32], strides = [1, 1]} : vector<8x128xf32> to vector<8x32xf32>
    %204 = math.tanh %202 : vector<8x32xf32>
    %205 = arith.mulf %203, %204 : vector<8x32xf32>
    %c7_i32 = arith.constant 7 : i32
    %206 = vector.broadcast %c7_i32 : i32 to vector<8x32xi32>
    %207 = arith.cmpi sgt, %22, %206 : vector<8x32xi32>
    %208 = arith.select %207, %205, %186 : vector<8x32xi1>, vector<8x32xf32>
    %209 = tpu.concatenate %6, %208 in 1 : vector<8x32xf32>, vector<8x32xf32> -> vector<8x64xf32>
    %c0_49 = arith.constant 0 : index
    %c0_50 = arith.constant 0 : index
    %210 = vector.load %arg10[%c0_49, %c0_50] : memref<8x64xf32, #tpu.memory_space<vmem>>, vector<8x64xf32>
    tpu.vector_store %arg10[%c0_49, %c0_50], %209 {strides = array<i32>} : memref<8x64xf32, #tpu.memory_space<vmem>>, vector<8x64xf32>,
    return
  }
}

</mosaic_0001>

<bundles_post_ra>
// kernel: vsequence_feature.1
= control target key start
LH: loop header
LB: loop body
LE: loop exit
PB: predicated region body
PF: predicated region fallthrough
CT: control target
= control target key end

     0   :  { %vm138_vm0 = vcmask 64512   ;;  %s1513_s0 = inlined_call_operand.vmem [shape: s32[8,1], index: 0, kind: input, shape index: {}]   ;;  %s1514_s1 = inlined_call_operand.vmem [shape: f32[8,16], index: 1, kind: input, shape index: {}]   ;;  %s1515_s2 = inlined_call_operand.vmem [shape: f32[64,8], index: 2, kind: input, shape index: {}]   ;;  %s1516_s3 = inlined_call_operand.vmem [shape: f32[16,32], index: 3, kind: input, shape index: {}]   ;;  %s1517_s4 = inlined_call_operand.vmem [shape: f32[1,32], index: 4, kind: input, shape index: {}]   ;;  %s1518_s5 = inlined_call_operand.vmem [shape: f32[8,16], index: 5, kind: input, shape index: {}]   ;;  %s1519_s6 = inlined_call_operand.vmem [shape: f32[1,16], index: 6, kind: input, shape index: {}]   ;;  %s1520_s7 = inlined_call_operand.vmem [shape: f32[16,128], index: 7, kind: input, shape index: {}]   ;;  %s1521_s8 = inlined_call_operand.vmem [shape: bf16[32,128], index: 8, kind: input, shape index: {}]   ;;  %s1522_s9 = inlined_call_operand.vmem [shape: f32[1,128], index: 9, kind: input, shape index: {}]   ;;  %s1523_s10 = inlined_call_operand.hbm [shape: f32[8,64], index: 10, kind: output, shape index: {}]  }
   0x1   :  { %v130_v0 = vld [vmem:[%s1518_s5] sm:$0xff]  ;;  %v123_v2 = vld [vmem:[%s1515_s2 + $0x8] sm:$0xff] }
   0x2   :  { %v122_v1 = vld [vmem:[%s1515_s2] sm:$0xff]  ;;  %1029 = vmatprep.subr.mxu1 %v130_v0 }
   0x3   :  { %1031 = vmatprep.mubr.msk.f32.mxu1 %vm138_vm0, %v122_v1  ;;  %1030 = vmatpush3.msra.mxu1 %v130_v0 }
   0x4   :  { %15 = vsyncpa [#allocation3], 0  ;;  %1032 = vmatmul.mubr.msk.f32.vlgmr.msra.gmra.mrb[0].mxu1 %vm138_vm0, %v123_v2  ;;  %v124_v3 = vld [vmem:[%s1515_s2 + $0x10] sm:$0xff]  ;;  %v125_v4 = vld [vmem:[%s1515_s2 + $0x18] sm:$0xff]  ;;  %v1216_v8 = vmov 0.0   ;;  %v1217_v9 = vmov 0.0|0.0   ;;  %v422_v53 = vlaneseq }
   0x5   :  { %1034 = vmatprep.mubr.msk.f32.mxu1 %vm138_vm0, %v124_v3  ;;  %v1300_v5 = vld [vmem:[%s1521_s8] sm:$0xff]   ;;  %1059 = vmatprep.subr.bf16.mxu1 %v1216_v8  ;;  %v39_v10 = vld [vmem:[%s1516_s3 + $0x8] sm:$0xff]  ;;  %v128_v13 = vld [vmem:[%s1515_s2 + $0x30] sm:$0xff]  ;;  %vm1218_vm1 = vmmov 0   ;;  %vm47_vm2 = vcmask 130048   ;;  %v1219_v20 = vmov 0  }
   0x6   :  { %v126_v6 = vld [vmem:[%s1515_s2 + $0x20] sm:$0xff]  ;;  %1123 = vmatprep.subr.bf16.mxu0 %v1217_v9  ;;  %v127_v11 = vld [vmem:[%s1515_s2 + $0x28] sm:$0xff]  ;;  %1060 = vmatpush3.bf16.msra.mxu1 %v1300_v5  ;;  %v129_v19 = vld [vmem:[%s1515_s2 + $0x38] sm:$0xff]  ;;  %v423_v54 = vand.u32 127, %v422_v53  ;;  %v1220_v59 = vmov 0.5   ;;  %vm439_vm5 = vcmask 261120  }
   0x7   :  { %v38_v7 = vld [vmem:[%s1516_s3] sm:$0xff]  ;;  %v277_v15 = vld [vmem:[%s1520_s7 + $0x8] sm:$0xff]  ;;  %1026 = vmatprep.mubr.msk.f32.mxu0 %vm1218_vm1, %v1216_v8  ;;  %1061 = vmatprep.subr.bf16.mxu1 %v1216_v8  ;;  %s1223_s25 = smov [#allocation2]   ;;  %vm931_vm13 = vcmask 523264  }
   0x8   :  { %1035 = vmatmul.mubr.msk.f32.gmra.mrb[2].mxu1 %vm138_vm0, %v125_v4  ;;  %v1124_v12 = vpack.c.bf16 %v39_v10, %v38_v7  ;;  %v276_v14 = vld [vmem:[%s1520_s7] sm:$0xff]  ;;  %v1333_v17 = vld [vmem:[%s1521_s8 + $0x8] sm:$0xff]   ;;  %1138 = vset.pattern.permute.xlu1 %v1219_v20  ;;  %vm424_vm3 = vcmp.ge.s32.totalorder %v423_v54, 96  ;;  %s939_s26 = sshll.u32 %s1223_s25, 4  ;;  %s940_s26 = int_to_ptr.vmem [resolvable:$true] %s939_s26 }
   0x9   :  { %1037 = vmatprep.mubr.msk.f32.mxu1 %vm138_vm0, %v126_v6  ;;  %v1126_v16 = vpack.c.bf16 %v277_v15, %v276_v14  ;;  %v37_v18 = vld [vmem:[%s1514_s1] sm:$0xff]  ;;  %1139 = vset.pattern.permute.xlu0 %v1219_v20  ;;  %v1384_v60 = vsel %vm424_vm3, 1.0, %v1220_v59  ;;  %v1387_v0 = vsel %vm424_vm3, 0.0, %v1220_v59  ;;  %s1192_s27 = scalar_lea.vmem %s940_s26, 128  ;;  %p1197_p1 = scmp.lt.s32.totalorder %s940_s26, %s940_s26 }
   0xa   :  { %1125 = vmatpush3.bf16.msra.mxu0 %v1124_v12  ;;  %1062 = vmatpush3.bf16.msra.mxu1 %v1333_v17  ;;  %v949_v21 = vld [vmem:[%s1519_s6] ss:$0 sm:$0xff]  ;;  %p1193_p0 = scmp.ne.s32.totalorder %s940_s26, %s1192_s27  ;;  %p1198_p2 = scmp.lt.s32.totalorder %s1192_s27, %s1192_s27 }
   0xb   :  { %1127 = vmatprep.subr.bf16.mxu0 %v1126_v16  ;;  %1075 = vmatprep.subr.bf16.mxu1 %v1216_v8  ;;  %v418_v52 = vld [vmem:[%s1513_s0] sm:$0xff]  ;;  %s1221_s0 = smov 64  }
   0xc   :  { %1038 = vmatmul.mubr.msk.f32.gmra.mrb[4].mxu1 %vm138_vm0, %v127_v11  ;;  %420 = vperm.xlu1 %1138, %v418_v52   ;;  %v1381_v55 = vld [vmem:[%s1522_s9] ss:$0 sm:$0xff]  ;;  %s1222_s9 = smov 32   ;;  %p1199_p3 = por %p1198_p2, %p1197_p1 }
   0xd   :  { %1040 = vmatprep.mubr.msk.f32.mxu1 %vm138_vm0, %v128_v13  ;;  %1027 = vmatmul.mubr.msk.f32.vlgmr.msra.gmra.mrb[0].mxu0 %vm47_vm2, %v37_v18 }
   0xe   :  { %1129 = vmatpush3.bf16.msra.mxu0 %v1126_v16  ;;  %p1200_p4 = pnand %p1199_p3, %p1193_p0 }
   0xf   :  { %1067 = vmatprep.subr.bf16.mxu0 %v1216_v8 }
  0x10   :  { %1041 = vmatmul.mubr.msk.f32.gmra.mrb[6].mxu1 %vm138_vm0, %v129_v19 }
  0x11   :  { %1063 = vmatprep.mubr.msk.bf16.mxu1 %vm1218_vm1, %v1216_v8 }
  0x14   :  { %1064 = vmatmul.mubr.bf16.vlgmr.msra.gmra.mrb[8].mxu1 %v1219_v20 }
  0x15   :  { %1076 = vmatpush3.bf16.msra.mxu1 %v1300_v5  ;;  %1079 = vmatprep.mubr.msk.bf16.mxu1 %vm1218_vm1, %v1216_v8 }
  0x16   :  { %1077 = vmatprep.subr.bf16.mxu1 %v1216_v8 }
  0x19   :  { %1078 = vmatpush3.bf16.msra.mxu1 %v1333_v17 }
  0x1a   :  { %1091 = vmatprep.subr.bf16.mxu1 %v1216_v8 }
  0x8b   :  { %v1403_v13 = vpop.permute.xlu1 %420 }
  0x8c   :  { %vm497_vm4 = vcmp.gt.s32.totalorder %v1403_v13, 0  ;;  %vm558_vm6 = vcmp.gt.s32.totalorder %v1403_v13, 1  ;;  %vm619_vm7 = vcmp.gt.s32.totalorder %v1403_v13, 2  ;;  %vm680_vm8 = vcmp.gt.s32.totalorder %v1403_v13, 3 }
  0x8d   :  { %vm741_vm9 = vcmp.gt.s32.totalorder %v1403_v13, 4  ;;  %vm802_vm10 = vcmp.gt.s32.totalorder %v1403_v13, 5  ;;  %vm863_vm11 = vcmp.gt.s32.totalorder %v1403_v13, 6  ;;  %vm924_vm12 = vcmp.gt.s32.totalorder %v1403_v13, 7 }
  0xd7   :  { %v1033_v22 = vpop.f32.mrb[0].mxu1 }
  0xd8   :  { %v235_v23 = vadd.f32 %v1033_v22, %v949_v21  ;;  %v229_v24 = vpop.f32.mrb[1].mxu1 }
  0xd9   :  { %v230_v25 = vadd.f32 %v949_v21, %v229_v24 }
  0xdb   :  { %1142 = vtanh.f32 %v230_v25  ;;  %v1036_v28 = vpop.f32.mrb[2].mxu1 }
  0xdc   :  { %1144 = vtanh.f32 %v235_v23  ;;  %v245_v29 = vadd.f32 %v1036_v28, %v949_v21  ;;  %v239_v30 = vpop.f32.mrb[3].mxu1 }
  0xdd   :  { %v240_v31 = vadd.f32 %v949_v21, %v239_v30 }
  0xde   :  { %1146 = vtanh.f32 %v245_v29 }
  0xdf   :  { %1148 = vtanh.f32 %v240_v31  ;;  %v1039_v32 = vpop.f32.mrb[4].mxu1 }
  0xe0   :  { %v255_v33 = vadd.f32 %v1039_v32, %v949_v21  ;;  %v249_v34 = vpop.f32.mrb[5].mxu1  ;;  %v1365_v36 = vpop.f32.mrb[0].mxu0 }
  0xe1   :  { %v250_v35 = vadd.f32 %v949_v21, %v249_v34  ;;  %v1028_v37 = vpop.f32.mrb[1].mxu0 }
  0xe2   :  { %1150 = vtanh.f32 %v255_v33 }
  0xe3   :  { %1152 = vtanh.f32 %v250_v35  ;;  %v1042_v38 = vpop.f32.mrb[6].mxu1 }
  0xe4   :  { %v265_v39 = vadd.f32 %v1042_v38, %v949_v21  ;;  %v259_v40 = vpop.f32.mrb[7].mxu1 }
  0xe5   :  { %v1143_v26 = vpop.eup %1142  ;;  %v260_v41 = vadd.f32 %v949_v21, %v259_v40 }
  0xe6   :  { %v1145_v27 = vpop.eup %1144  ;;  %1047 = vmatprep.mubr.msk.f32.mxu0 %vm47_vm2, %v1143_v26  ;;  %1154 = vtanh.f32 %v265_v39 }
  0xe7   :  { %1048 = vmatmul.mubr.msk.f32.vlgmr.msra.gmra.mrb[2].mxu0 %vm47_vm2, %v1145_v27  ;;  %1156 = vtanh.f32 %v260_v41  ;;  %v477_v42 = vpop.f32.mrb[8].mxu1 }
  0xe8   :  { %1068 = vmatpush3.bf16.msra.mxu0 %v1300_v5  ;;  %v1147_v43 = vpop.eup %1146  ;;  %v1065_v44 = vpop.f32.mrb[9].mxu1 }
  0xe9   :  { %1069 = vmatprep.subr.bf16.mxu0 %v1216_v8  ;;  %v1149_v45 = vpop.eup %1148  ;;  %v480_v46 = vpop.f32.mrb[10].mxu1 }
  0xea   :  { %1050 = vmatprep.mubr.msk.f32.mxu0 %vm47_vm2, %v1149_v45  ;;  %v1066_v47 = vpop.f32.mrb[11].mxu1 }
  0xeb   :  { %1051 = vmatmul.mubr.msk.f32.gmra.mrb[4].mxu0 %vm47_vm2, %v1147_v43 }
  0xec   :  { %1070 = vmatpush3.bf16.msra.mxu0 %v1333_v17  ;;  %v1151_v48 = vpop.eup %1150 }
  0xed   :  { %1083 = vmatprep.subr.bf16.mxu0 %v1216_v8  ;;  %v1153_v49 = vpop.eup %1152 }
  0xee   :  { %1053 = vmatprep.mubr.msk.f32.mxu0 %vm47_vm2, %v1153_v49 }
  0xef   :  { %1054 = vmatmul.mubr.msk.f32.gmra.mrb[6].mxu0 %vm47_vm2, %v1151_v48 }
  0xf0   :  { %v1155_v50 = vpop.eup %1154 }
  0xf1   :  { %v1157_v51 = vpop.eup %1156 }
  0xf2   :  { %1056 = vmatprep.mubr.msk.f32.mxu0 %vm47_vm2, %v1157_v51 }
  0xf3   :  { %1057 = vmatmul.mubr.msk.f32.gmra.mrb[8].mxu0 %vm47_vm2, %v1155_v50 }
  0xf4   :  { %1071 = vmatprep.mubr.msk.bf16.mxu0 %vm1218_vm1, %v1216_v8 }
 0x1ba   :  { %v1049_v56 = vpop.f32.mrb[2].mxu0 }
 0x1bb   :  { %v375_v57 = vpop.f32.mrb[3].mxu0  ;;  %v381_v23 = vadd.f32 %v1049_v56, %v1381_v55 }
 0x1bc   :  { %v376_v58 = vadd.f32 %v1381_v55, %v375_v57 }
 0x1be   :  { %v483_v61 = vadd.f32 %v477_v42, %v376_v58  ;;  %v1392_v3 = vpop.f32.mrb[4].mxu0 }
 0x1bf   :  { %v385_v4 = vpop.f32.mrb[5].mxu0 }
 0x1c0   :  { %v484_v62 = vmul.f32 %v483_v61, %v1384_v60  ;;  %v386_v44 = vadd.f32 %v1381_v55, %v385_v4  ;;  %v391_v4 = vadd.f32 %v1392_v3, %v1381_v55 }
 0x1c2   :  { %1158 = vtanh.f32 %v484_v62  ;;  %v1394_v6 = vpop.f32.mrb[6].mxu0 }
 0x1c3   :  { %v1396_v7 = vpop.f32.mrb[7].mxu0 }
 0x1c6   :  { %v1398_v9 = vpop.f32.mrb[8].mxu0 }
 0x1c7   :  { %v1400_v10 = vpop.f32.mrb[9].mxu0 }
 0x1cc   :  { %v1159_v63 = vpop.eup %1158 }
 0x1cd   :  { %v486_v1 = vmul.f32 %v1159_v63, %v1384_v60 }
 0x1cf   :  { %v487_v2 = vadd.f32 %v486_v1, %v1387_v0 }
 0x1d1   :  { %488 = vrot.lane.b32.xlu0 %v487_v2, %s1221_s0  ;;  %v493_v14 = vmul.f32 0.0, %v487_v2 }
 0x243   :  { %v489_v11 = vpop.permute.xlu0 %488 }
 0x244   :  { %v490_v12 = vmul.f32 %v489_v11, %v487_v2 }
 0x246   :  { %491 = vrot.lane.b32.xlu0 %v490_v12, %s1222_s9 }
 0x2b8   :  { %v492_v15 = vpop.permute.xlu0 %491 }
 0x2b9   :  { %v494_v16 = vadd.f32 %v493_v14, %v492_v15 }
 0x2bb   :  { %1160 = vtanh.f32 %v494_v16  ;;  %v499_v18 = vsel %vm497_vm4, %v494_v16, 0.0 }
 0x2c5   :  { %v1161_v19 = vpop.eup %1160 }
 0x2c6   :  { %v496_v20 = vmul.f32 %v1161_v19, %v489_v11 }
 0x2c8   :  { %v498_v21 = vsel %vm497_vm4, %v496_v20, 0.0 }
 0x2c9   :  { %v500_v22 = vpack.c.bf16 %v498_v21, %v498_v21 }
 0x2cb   :  { %1072 = vmatmul.mubr.msk.bf16.vlgmr.msra.gmra.mrb[12].mxu0 %vm439_vm5, %v500_v22 }
 0x2cc   :  { %1084 = vmatpush3.bf16.msra.mxu0 %v1300_v5  ;;  %1087 = vmatprep.mubr.msk.bf16.mxu0 %vm1218_vm1, %v1216_v8 }
 0x2cd   :  { %1085 = vmatprep.subr.bf16.mxu0 %v1216_v8 }
 0x2d0   :  { %1086 = vmatpush3.bf16.msra.mxu0 %v1333_v17 }
 0x2d1   :  { %1099 = vmatprep.subr.bf16.mxu0 %v1216_v8 }
 0x39e   :  { %v538_v24 = vpop.f32.mrb[12].mxu0 }
 0x39f   :  { %v544_v25 = vadd.f32 %v538_v24, %v381_v23  ;;  %v1073_v26 = vpop.f32.mrb[13].mxu0 }
 0x3a0   :  { %v541_v27 = vpop.f32.mrb[14].mxu0 }
 0x3a1   :  { %v545_v28 = vmul.f32 %v544_v25, %v1384_v60  ;;  %v1074_v29 = vpop.f32.mrb[15].mxu0 }
 0x3a3   :  { %1162 = vtanh.f32 %v545_v28 }
 0x3ad   :  { %v1163_v30 = vpop.eup %1162 }
 0x3ae   :  { %v547_v31 = vmul.f32 %v1163_v30, %v1384_v60 }
 0x3b0   :  { %v548_v32 = vadd.f32 %v547_v31, %v1387_v0  ;;  %v396_v31 = vadd.f32 %v1381_v55, %v1396_v7 }
 0x3b2   :  { %549 = vrot.lane.b32.xlu1 %v548_v32, %s1221_s0  ;;  %v554_v35 = vmul.f32 %v548_v32, %v499_v18 }
 0x424   :  { %v550_v33 = vpop.permute.xlu1 %549 }
 0x425   :  { %v551_v34 = vmul.f32 %v550_v33, %v548_v32 }
 0x427   :  { %552 = vrot.lane.b32.xlu0 %v551_v34, %s1222_s9 }
 0x499   :  { %v553_v37 = vpop.permute.xlu0 %552 }
 0x49a   :  { %v555_v38 = vadd.f32 %v554_v35, %v553_v37 }
 0x49c   :  { %1164 = vtanh.f32 %v555_v38  ;;  %v560_v39 = vsel %vm558_vm6, %v555_v38, %v499_v18 }
 0x4a6   :  { %v1165_v40 = vpop.eup %1164 }
 0x4a7   :  { %v557_v41 = vmul.f32 %v1165_v40, %v550_v33 }
 0x4a9   :  { %v559_v42 = vsel %vm558_vm6, %v557_v41, %v498_v21 }
 0x4aa   :  { %v561_v43 = vpack.c.bf16 %v559_v42, %v559_v42 }
 0x4ac   :  { %1080 = vmatmul.mubr.msk.bf16.vlgmr.msra.gmra.mrb[12].mxu1 %vm439_vm5, %v561_v43 }
 0x4ad   :  { %1092 = vmatpush3.bf16.msra.mxu1 %v1300_v5  ;;  %1095 = vmatprep.mubr.msk.bf16.mxu1 %vm1218_vm1, %v1216_v8 }
 0x4ae   :  { %1093 = vmatprep.subr.bf16.mxu1 %v1216_v8 }
 0x4b1   :  { %1094 = vmatpush3.bf16.msra.mxu1 %v1333_v17 }
 0x4b2   :  { %1107 = vmatprep.subr.bf16.mxu1 %v1216_v8 }
 0x57f   :  { %v599_v45 = vpop.f32.mrb[12].mxu1 }
 0x580   :  { %v605_v46 = vadd.f32 %v599_v45, %v386_v44  ;;  %v1081_v47 = vpop.f32.mrb[13].mxu1 }
 0x581   :  { %v602_v48 = vpop.f32.mrb[14].mxu1 }
 0x582   :  { %v606_v49 = vmul.f32 %v605_v46, %v1384_v60  ;;  %v1082_v50 = vpop.f32.mrb[15].mxu1 }
 0x584   :  { %1166 = vtanh.f32 %v606_v49 }
 0x58e   :  { %v1167_v51 = vpop.eup %1166 }
 0x58f   :  { %v608_v52 = vmul.f32 %v1167_v51, %v1384_v60  ;;  %v401_v51 = vadd.f32 %v1394_v6, %v1381_v55 }
 0x591   :  { %v609_v53 = vadd.f32 %v608_v52, %v1387_v0 }
 0x593   :  { %610 = vrot.lane.b32.xlu1 %v609_v53, %s1221_s0  ;;  %v615_v57 = vmul.f32 %v609_v53, %v560_v39 }
 0x605   :  { %v611_v54 = vpop.permute.xlu1 %610 }
 0x606   :  { %v612_v56 = vmul.f32 %v611_v54, %v609_v53 }
 0x608   :  { %613 = vrot.lane.b32.xlu0 %v612_v56, %s1222_s9 }
 0x67a   :  { %v614_v58 = vpop.permute.xlu0 %613 }
 0x67b   :  { %v616_v59 = vadd.f32 %v615_v57, %v614_v58 }
 0x67d   :  { %1168 = vtanh.f32 %v616_v59  ;;  %v621_v61 = vsel %vm619_vm7, %v616_v59, %v560_v39 }
 0x687   :  { %v1169_v62 = vpop.eup %1168 }
 0x688   :  { %v618_v63 = vmul.f32 %v1169_v62, %v611_v54 }
 0x68a   :  { %v620_v1 = vsel %vm619_vm7, %v618_v63, %v559_v42 }
 0x68b   :  { %v622_v2 = vpack.c.bf16 %v620_v1, %v620_v1 }
 0x68d   :  { %1088 = vmatmul.mubr.msk.bf16.vlgmr.msra.gmra.mrb[16].mxu0 %vm439_vm5, %v622_v2 }
 0x68e   :  { %1100 = vmatpush3.bf16.msra.mxu0 %v1300_v5  ;;  %1103 = vmatprep.mubr.msk.bf16.mxu0 %vm1218_vm1, %v1216_v8 }
 0x68f   :  { %1101 = vmatprep.subr.bf16.mxu0 %v1216_v8 }
 0x692   :  { %1102 = vmatpush3.bf16.msra.mxu0 %v1333_v17 }
 0x693   :  { %1115 = vmatprep.subr.bf16.mxu0 %v1216_v8 }
 0x760   :  { %v660_v11 = vpop.f32.mrb[16].mxu0 }
 0x761   :  { %v666_v12 = vadd.f32 %v660_v11, %v391_v4  ;;  %v1089_v14 = vpop.f32.mrb[17].mxu0 }
 0x762   :  { %v663_v15 = vpop.f32.mrb[18].mxu0  ;;  %v406_v14 = vadd.f32 %v1381_v55, %v1400_v10 }
 0x763   :  { %v667_v16 = vmul.f32 %v666_v12, %v1384_v60  ;;  %v1090_v18 = vpop.f32.mrb[19].mxu0 }
 0x765   :  { %1170 = vtanh.f32 %v667_v16 }
 0x76f   :  { %v1171_v19 = vpop.eup %1170 }
 0x770   :  { %v669_v20 = vmul.f32 %v1171_v19, %v1384_v60 }
 0x772   :  { %v670_v21 = vadd.f32 %v669_v20, %v1387_v0 }
 0x774   :  { %671 = vrot.lane.b32.xlu1 %v670_v21, %s1221_s0  ;;  %v676_v3 = vmul.f32 %v670_v21, %v621_v61 }
 0x7e6   :  { %v672_v22 = vpop.permute.xlu1 %671 }
 0x7e7   :  { %v673_v23 = vmul.f32 %v672_v22, %v670_v21 }
 0x7e9   :  { %674 = vrot.lane.b32.xlu0 %v673_v23, %s1222_s9 }
 0x85b   :  { %v675_v24 = vpop.permute.xlu0 %674 }
 0x85c   :  { %v677_v25 = vadd.f32 %v676_v3, %v675_v24 }
 0x85e   :  { %1172 = vtanh.f32 %v677_v25  ;;  %v682_v26 = vsel %vm680_vm8, %v677_v25, %v621_v61 }
 0x868   :  { %v1173_v27 = vpop.eup %1172 }
 0x869   :  { %v679_v28 = vmul.f32 %v1173_v27, %v672_v22 }
 0x86b   :  { %v681_v29 = vsel %vm680_vm8, %v679_v28, %v620_v1 }
 0x86c   :  { %v683_v30 = vpack.c.bf16 %v681_v29, %v681_v29 }
 0x86e   :  { %1096 = vmatmul.mubr.msk.bf16.vlgmr.msra.gmra.mrb[16].mxu1 %vm439_vm5, %v683_v30 }
 0x86f   :  { %1108 = vmatpush3.bf16.msra.mxu1 %v1300_v5  ;;  %1111 = vmatprep.mubr.msk.bf16.mxu1 %vm1218_vm1, %v1216_v8 }
 0x870   :  { %1109 = vmatprep.subr.bf16.mxu1 %v1216_v8 }
 0x873   :  { %1110 = vmatpush3.bf16.msra.mxu1 %v1333_v17 }
 0x941   :  { %v721_v32 = vpop.f32.mrb[16].mxu1 }
 0x942   :  { %v727_v33 = vadd.f32 %v721_v32, %v396_v31  ;;  %v1097_v34 = vpop.f32.mrb[17].mxu1 }
 0x943   :  { %v724_v35 = vpop.f32.mrb[18].mxu1 }
 0x944   :  { %v728_v37 = vmul.f32 %v727_v33, %v1384_v60  ;;  %v1098_v38 = vpop.f32.mrb[19].mxu1  ;;  %v411_v33 = vadd.f32 %v1398_v9, %v1381_v55 }
 0x946   :  { %1174 = vtanh.f32 %v728_v37 }
 0x950   :  { %v1175_v39 = vpop.eup %1174 }
 0x951   :  { %v730_v40 = vmul.f32 %v1175_v39, %v1384_v60 }
 0x953   :  { %v731_v41 = vadd.f32 %v730_v40, %v1387_v0 }
 0x955   :  { %732 = vrot.lane.b32.xlu1 %v731_v41, %s1221_s0  ;;  %v737_v7 = vmul.f32 %v731_v41, %v682_v26 }
 0x9c7   :  { %v733_v42 = vpop.permute.xlu1 %732 }
 0x9c8   :  { %v734_v43 = vmul.f32 %v733_v42, %v731_v41 }
 0x9ca   :  { %735 = vrot.lane.b32.xlu0 %v734_v43, %s1222_s9 }
 0xa3c   :  { %v736_v44 = vpop.permute.xlu0 %735 }
 0xa3d   :  { %v738_v45 = vadd.f32 %v737_v7, %v736_v44 }
 0xa3f   :  { %1176 = vtanh.f32 %v738_v45  ;;  %v743_v46 = vsel %vm741_vm9, %v738_v45, %v682_v26 }
 0xa49   :  { %v1177_v47 = vpop.eup %1176 }
 0xa4a   :  { %v740_v48 = vmul.f32 %v1177_v47, %v733_v42 }
 0xa4c   :  { %v742_v49 = vsel %vm741_vm9, %v740_v48, %v681_v29 }
 0xa4d   :  { %v744_v50 = vpack.c.bf16 %v742_v49, %v742_v49 }
 0xa4f   :  { %1104 = vmatmul.mubr.msk.bf16.vlgmr.msra.gmra.mrb[20].mxu0 %vm439_vm5, %v744_v50 }
 0xa50   :  { %1116 = vmatpush3.bf16.msra.mxu0 %v1300_v5  ;;  %1119 = vmatprep.mubr.msk.bf16.mxu0 %vm1218_vm1, %v1216_v8 }
 0xa51   :  { %1117 = vmatprep.subr.bf16.mxu0 %v1216_v8 }
 0xa54   :  { %1118 = vmatpush3.bf16.msra.mxu0 %v1333_v17 }
 0xb22   :  { %v782_v52 = vpop.f32.mrb[20].mxu0 }
 0xb23   :  { %v788_v53 = vadd.f32 %v782_v52, %v401_v51  ;;  %v1105_v54 = vpop.f32.mrb[21].mxu0 }
 0xb24   :  { %v785_v56 = vpop.f32.mrb[22].mxu0 }
 0xb25   :  { %v789_v57 = vmul.f32 %v788_v53, %v1384_v60  ;;  %v1106_v58 = vpop.f32.mrb[23].mxu0 }
 0xb27   :  { %1178 = vtanh.f32 %v789_v57 }
 0xb31   :  { %v1179_v59 = vpop.eup %1178 }
 0xb32   :  { %v791_v5 = vmul.f32 %v1179_v59, %v1384_v60 }
 0xb34   :  { %v792_v61 = vadd.f32 %v791_v5, %v1387_v0 }
 0xb36   :  { %793 = vrot.lane.b32.xlu1 %v792_v61, %s1221_s0  ;;  %v798_v6 = vmul.f32 %v792_v61, %v743_v46 }
 0xba8   :  { %v794_v8 = vpop.permute.xlu1 %793 }
 0xba9   :  { %v795_v17 = vmul.f32 %v794_v8, %v792_v61 }
 0xbab   :  { %796 = vrot.lane.b32.xlu0 %v795_v17, %s1222_s9 }
 0xc1d   :  { %v797_v62 = vpop.permute.xlu0 %796 }
 0xc1e   :  { %v799_v63 = vadd.f32 %v798_v6, %v797_v62 }
 0xc20   :  { %1180 = vtanh.f32 %v799_v63  ;;  %v804_v1 = vsel %vm802_vm10, %v799_v63, %v743_v46 }
 0xc2a   :  { %v1181_v2 = vpop.eup %1180 }
 0xc2b   :  { %v801_v4 = vmul.f32 %v1181_v2, %v794_v8 }
 0xc2d   :  { %v803_v11 = vsel %vm802_vm10, %v801_v4, %v742_v49 }
 0xc2e   :  { %v805_v12 = vpack.c.bf16 %v803_v11, %v803_v11 }
 0xc30   :  { %1112 = vmatmul.mubr.msk.bf16.vlgmr.msra.gmra.mrb[20].mxu1 %vm439_vm5, %v805_v12 }
 0xd03   :  { %v843_v15 = vpop.f32.mrb[20].mxu1 }
 0xd04   :  { %v849_v16 = vadd.f32 %v843_v15, %v406_v14  ;;  %v1113_v18 = vpop.f32.mrb[21].mxu1 }
 0xd05   :  { %v846_v19 = vpop.f32.mrb[22].mxu1 }
 0xd06   :  { %v850_v20 = vmul.f32 %v849_v16, %v1384_v60  ;;  %v1114_v21 = vpop.f32.mrb[23].mxu1 }
 0xd08   :  { %1182 = vtanh.f32 %v850_v20 }
 0xd12   :  { %v1183_v22 = vpop.eup %1182 }
 0xd13   :  { %v852_v23 = vmul.f32 %v1183_v22, %v1384_v60 }
 0xd15   :  { %v853_v3 = vadd.f32 %v852_v23, %v1387_v0 }
 0xd17   :  { %854 = vrot.lane.b32.xlu1 %v853_v3, %s1221_s0  ;;  %v859_v10 = vmul.f32 %v853_v3, %v804_v1 }
 0xd89   :  { %v855_v24 = vpop.permute.xlu1 %854 }
 0xd8a   :  { %v856_v25 = vmul.f32 %v855_v24, %v853_v3 }
 0xd8c   :  { %857 = vrot.lane.b32.xlu0 %v856_v25, %s1222_s9 }
 0xdfe   :  { %v858_v26 = vpop.permute.xlu0 %857 }
 0xdff   :  { %v860_v27 = vadd.f32 %v859_v10, %v858_v26 }
 0xe01   :  { %1184 = vtanh.f32 %v860_v27  ;;  %v865_v28 = vsel %vm863_vm11, %v860_v27, %v804_v1 }
 0xe0b   :  { %v1185_v29 = vpop.eup %1184 }
 0xe0c   :  { %v862_v30 = vmul.f32 %v1185_v29, %v855_v24 }
 0xe0e   :  { %v864_v31 = vsel %vm863_vm11, %v862_v30, %v803_v11 }
 0xe0f   :  { %v866_v32 = vpack.c.bf16 %v864_v31, %v864_v31 }
 0xe11   :  { %1120 = vmatmul.mubr.msk.bf16.vlgmr.msra.gmra.mrb[24].mxu0 %vm439_vm5, %v866_v32 }
 0xee4   :  { %v904_v34 = vpop.f32.mrb[24].mxu0 }
 0xee5   :  { %v910_v35 = vadd.f32 %v904_v34, %v411_v33  ;;  %v1121_v37 = vpop.f32.mrb[25].mxu0 }
 0xee6   :  { %v907_v38 = vpop.f32.mrb[26].mxu0 }
 0xee7   :  { %v911_v39 = vmul.f32 %v910_v35, %v1384_v60  ;;  %v1122_v40 = vpop.f32.mrb[27].mxu0 }
 0xee9   :  { %1186 = vtanh.f32 %v911_v39 }
 0xef3   :  { %v1187_v41 = vpop.eup %1186 }
 0xef4   :  { %v913_v42 = vmul.f32 %v1187_v41, %v1384_v60  ;;  %v947_v60 = vld [vmem:[%s1517_s4] ss:$0 sm:$0xff] }
 0xef6   :  { %v914_v43 = vadd.f32 %v913_v42, %v1387_v0  ;;  %v118_v0 = vadd.f32 %v947_v60, %v1365_v36 }
 0xef8   :  { %915 = vrot.lane.b32.xlu1 %v914_v43, %s1221_s0  ;;  %v920_v55 = vmul.f32 %v914_v43, %v865_v28 }
 0xf6a   :  { %v916_v7 = vpop.permute.xlu1 %915 }
 0xf6b   :  { %v917_v44 = vmul.f32 %v916_v7, %v914_v43 }
 0xf6d   :  { %918 = vrot.lane.b32.xlu0 %v917_v44, %s1222_s9 }
 0xfdf   :  { %v919_v9 = vpop.permute.xlu0 %918 }
 0xfe0   :  { %v921_v45 = vadd.f32 %v920_v55, %v919_v9 }
 0xfe2   :  { %1188 = vtanh.f32 %v921_v45 }
 0xfe3   :  { %1190 = vtanh.f32 %v118_v0 }
 0xfec   :  { %v1189_v46 = vpop.eup %1188 }
 0xfed   :  { %v923_v47 = vmul.f32 %v1189_v46, %v916_v7  ;;  %v1191_v49 = vpop.eup %1190 }
 0xfef   :  { %v925_v48 = vsel %vm924_vm12, %v923_v47, %v864_v31 }
 0xff0   :  { %927 = vrot.lane.b32.xlu1 %v925_v48, %s1222_s9 }
0x1062   :  { %v928_v50 = vpop.permute.xlu1 %927 }
0x1063   :  { %v930_v51 = vsel %vm439_vm5, %v1191_v49, %v928_v50 }
0x1064   :  { %932 = vst.msk [vmem:[#allocation2] sm:$0xff] %vm931_vm13, %v930_v51 }
0x1065   :  { %1203 = shalt.err (!%p1200_p4)
}
0x1066   :  { %s1204_s29 = scalar_lea.hbm %s1523_s10, 128 }
0x1067   :  { %p1205_p5 = scmp.ne.s32.totalorder %s1523_s10, %s1204_s29  ;;  %p1208_p6 = scmp.lt.u32.totalorder %s1204_s29, %s1523_s10 }
0x1069   :  { %p1210_p7 = pnand %p1208_p6, %p1205_p5 }
0x106b   :  { %1213 = shalt.err (!%p1210_p7)
}
0x106c   :  { %942 = dma.vmem_to_hbm [thread:$0]  %s940_s26, 128, %s1523_s10, [#allocation3]  }
0x106d   :  { %1214 = dma.done.wait [#allocation3], 128  }
0x106e   :  { %1215 = vsyncadd [#allocation3], 4294967168 }
0x106f   :  { %946 = vsyncpa [#allocation3], 1 }

</bundles_post_ra>
